<compile_context>
chip_gen: v6e
topology: v6e:2x2x1
jax: 0.10.0
libtpu: 0.0.40
codegen_flags: <defaults>
</compile_context>

<pallas_src>
import math

import jax
import jax.numpy as jnp
from jax.experimental import pallas as pl
from jax.experimental.pallas import tpu as pltpu

N_CHANNELS = 128            # torch default n_channels
HIDDEN = 2 * N_CHANNELS     # lin1 output width = 256
HALF = N_CHANNELS // 2      # 64 sinusoidal frequencies
BATCH = 8                   # small test batch (one sublane group)

# Lane-alignment guards: the zero-cost static slices of the packed constant slab and the
# lane-dense output stores rely on these (see perf-review correctness concern #2).
assert N_CHANNELS % 128 == 0, "n_channels must be a multiple of 128 for this kernel"
assert HIDDEN % 128 == 0

# Packed-constant slab layout (all starts & widths are multiples of 128):
_B1_OFF = 0
_B2_OFF = HIDDEN                       # 256
_FRQ_OFF = HIDDEN + N_CHANNELS         # 384
_PHS_OFF = HIDDEN + 2 * N_CHANNELS     # 512
_CONST_W = HIDDEN + 3 * N_CHANNELS     # 640


# ------------------------------- Pallas kernel ---------------------------------

def _time_embedding_kernel(t_ref, const_ref, w1_ref, w2_ref, out_ref):
    # t_ref    : (B, 1)   f32   raw timesteps
    # const_ref: (1, 640) f32   [ b1 | b2 | freqs_tiled | phase ]  (single packed DMA)
    # w1_ref   : (128, 256) bf16
    # w2_ref   : (256, 128) bf16
    # out_ref  : (B, 128) f32
    b1 = const_ref[:, _B1_OFF:_B1_OFF + HIDDEN]            # (1, 256) zero-cost views
    b2 = const_ref[:, _B2_OFF:_B2_OFF + N_CHANNELS]        # (1, 128)
    freqs = const_ref[:, _FRQ_OFF:_FRQ_OFF + N_CHANNELS]   # (1, 128)  [f, f] tiled
    phase = const_ref[:, _PHS_OFF:_PHS_OFF + N_CHANNELS]   # (1, 128)  [0, pi/2]

    # Fused sinusoidal features: sin(t*f) for lanes 0:64, sin(t*f + pi/2) = cos(t*f)
    # for lanes 64:128 -> one lane-dense transcendental, no concat, no sub-128 slices.
    t = t_ref[...]                                          # (B, 1) f32
    emb = jnp.sin(t * freqs + phase)                        # (B, 128) f32

    # lin1: bf16 x bf16 -> f32 accumulate on the MXU
    h = jnp.dot(emb.astype(jnp.bfloat16), w1_ref[...],
                preferred_element_type=jnp.float32) + b1
    h = h * (1.0 / (1.0 + jnp.exp(-h)))                     # swish, f32 elementwise

    # lin2
    out_ref[...] = jnp.dot(h.astype(jnp.bfloat16), w2_ref[...],
                           preferred_element_type=jnp.float32) + b2


# ---------------------------------- wrapper -------------------------------------

def time_embedding_forward(params, t):
    B = t.shape[0]
    t2 = t.astype(jnp.float32).reshape(B, 1)
    vspec = pl.BlockSpec(memory_space=pltpu.MemorySpace.VMEM)
    return pl.pallas_call(
        _time_embedding_kernel,
        out_shape=jax.ShapeDtypeStruct((B, N_CHANNELS), jnp.float32),
        in_specs=[vspec, vspec, vspec, vspec],
        out_specs=vspec,
    )(t2, params["const_packed"], params["w1_bf16"], params["w2_bf16"])


# -------------------------- params & pure-JAX references ------------------------

def _make_freqs():
    scale = math.log(10000.0) / (HALF - 1)
    return jnp.exp(jnp.arange(HALF, dtype=jnp.float32) * -scale)   # (64,)


def init_params(key):
    k1, k2, k3, k4 = jax.random.split(key, 4)

    def uni(k, shape, fan_in):
        bound = 1.0 / math.sqrt(fan_in)
        return jax.random.uniform(k, shape, jnp.float32, -bound, bound)

    w1 = uni(k1, (N_CHANNELS, HIDDEN), N_CHANNELS)   # pre-transposed vs torch Linear.weight
    b1 = uni(k2, (1, HIDDEN), N_CHANNELS)
    w2 = uni(k3, (HIDDEN, N_CHANNELS), HIDDEN)
    b2 = uni(k4, (1, N_CHANNELS), HIDDEN)

    freqs = _make_freqs()                                           # (64,)
    freqs_tiled = jnp.concatenate([freqs, freqs])[None, :]          # (1, 128)
    phase = jnp.concatenate([jnp.zeros((HALF,), jnp.float32),
                             jnp.full((HALF,), 0.5 * math.pi, jnp.float32)])[None, :]

    const_packed = jnp.concatenate([b1, b2, freqs_tiled, phase], axis=1)  # (1, 640)
    assert const_packed.shape == (1, _CONST_W)

    return {
        "w1_f32": w1, "w2_f32": w2, "b1_f32": b1, "b2_f32": b2,     # f32 masters (reference)
        "w1_bf16": w1.astype(jnp.bfloat16),                          # bf16 DMA copies (kernel)
        "w2_bf16": w2.astype(jnp.bfloat16),
        "const_packed": const_packed,                                # single packed constant slab
    }


def _swish(x):
    return x * (1.0 / (1.0 + jnp.exp(-x)))


def _reference_quantized(params, t):
    """Mimics the kernel math (phase-trick features + bf16 weight/activation quant)."""
    hp = jax.lax.Precision.HIGHEST
    freqs_tiled = params["const_packed"][:, _FRQ_OFF:_FRQ_OFF + N_CHANNELS]
    phase = params["const_packed"][:, _PHS_OFF:_PHS_OFF + N_CHANNELS]
    b1 = params["const_packed"][:, _B1_OFF:_B1_OFF + HIDDEN]
    b2 = params["const_packed"][:, _B2_OFF:_B2_OFF + N_CHANNELS]
    w1 = params["w1_bf16"].astype(jnp.float32)
    w2 = params["w2_bf16"].astype(jnp.float32)
    emb = jnp.sin(t.astype(jnp.float32)[:, None] * freqs_tiled + phase)
    h = jnp.dot(emb.astype(jnp.bfloat16).astype(jnp.float32), w1, precision=hp) + b1
    h = _swish(h)
    return jnp.dot(h.astype(jnp.bfloat16).astype(jnp.float32), w2, precision=hp) + b2


def _reference_f32(params, t):
    """Full-precision torch-module semantics (the 'true' TimeEmbedding forward)."""
    hp = jax.lax.Precision.HIGHEST
    freqs = _make_freqs()
    arg = t.astype(jnp.float32)[:, None] * freqs[None, :]
    emb = jnp.concatenate([jnp.sin(arg), jnp.cos(arg)], axis=1)      # (B, 128)
    # (n_channels=128 is even -> the torch zero-padding branch is statically dead)
    h = jnp.dot(emb, params["w1_f32"], precision=hp) + params["b1_f32"]
    h = _swish(h)
    return jnp.dot(h, params["w2_f32"], precision=hp) + params["b2_f32"]


if __name__ == "__main__":
    key = jax.random.PRNGKey(0)
    kp, kt = jax.random.split(key)

    params = init_params(kp)
    t = jax.random.uniform(kt, (BATCH,), jnp.float32, 0.0, 1000.0)   # diffusion-style timesteps

    out = jax.jit(time_embedding_forward)(params, t)
    out = jax.block_until_ready(out)

    assert out.shape == (BATCH, N_CHANNELS), out.shape
    assert bool(jnp.all(jnp.isfinite(out)))

    ref_q = _reference_quantized(params, t)     # tight check vs bf16-quantized kernel math
    ref_f = _reference_f32(params, t)           # loose check vs full-f32 module math
    err_q = float(jnp.max(jnp.abs(out - ref_q)))
    err_f = float(jnp.max(jnp.abs(out - ref_f)))
    assert err_q < 2e-2, f"kernel vs quantized reference: max abs err = {err_q}"
    assert err_f < 5e-2, f"kernel vs f32 reference: max abs err = {err_f}"

    print("KERNEL_OK")
</pallas_src>

<mosaic_0001>
module attributes {stable_mosaic.version = 11 : i64} {
  func.func @_time_embedding_kernel(%arg0: memref<8x1xf32, #tpu.memory_space<vmem>>, %arg1: memref<1x640xf32, #tpu.memory_space<vmem>>, %arg2: memref<128x256xbf16, #tpu.memory_space<vmem>>, %arg3: memref<256x128xbf16, #tpu.memory_space<vmem>>, %arg4: memref<8x128xf32, #tpu.memory_space<vmem>>) attributes {dimension_semantics = [], scalar_prefetch = 0 : i64, scratch_operands = 0 : i64, tpu.core_type = #tpu.core_type<tc>} {
    %c0 = arith.constant 0 : index
    %c0_0 = arith.constant 0 : index
    %0 = vector.load %arg1[%c0, %c0_0] : memref<1x640xf32, #tpu.memory_space<vmem>>, vector<1x256xf32>
    %c0_1 = arith.constant 0 : index
    %c256 = arith.constant 256 : index
    %1 = vector.load %arg1[%c0_1, %c256] : memref<1x640xf32, #tpu.memory_space<vmem>>, vector<1x128xf32>
    %c0_2 = arith.constant 0 : index
    %c384 = arith.constant 384 : index
    %2 = vector.load %arg1[%c0_2, %c384] : memref<1x640xf32, #tpu.memory_space<vmem>>, vector<1x128xf32>
    %c0_3 = arith.constant 0 : index
    %c512 = arith.constant 512 : index
    %3 = vector.load %arg1[%c0_3, %c512] : memref<1x640xf32, #tpu.memory_space<vmem>>, vector<1x128xf32>
    %c0_4 = arith.constant 0 : index
    %c0_5 = arith.constant 0 : index
    %4 = vector.load %arg0[%c0_4, %c0_5] : memref<8x1xf32, #tpu.memory_space<vmem>>, vector<8x1xf32>
    %5 = vector.broadcast %4 : vector<8x1xf32> to vector<8x128xf32>
    %6 = vector.broadcast %2 : vector<1x128xf32> to vector<8x128xf32>
    %7 = arith.mulf %5, %6 : vector<8x128xf32>
    %8 = vector.broadcast %3 : vector<1x128xf32> to vector<8x128xf32>
    %9 = arith.addf %7, %8 : vector<8x128xf32>
    %10 = math.sin %9 : vector<8x128xf32>
    %11 = arith.truncf %10 : vector<8x128xf32> to vector<8x128xbf16>
    %c0_6 = arith.constant 0 : index
    %c0_7 = arith.constant 0 : index
    %12 = vector.load %arg2[%c0_6, %c0_7] : memref<128x256xbf16, #tpu.memory_space<vmem>>, vector<128x256xbf16>
    %cst = arith.constant dense<0.000000e+00> : vector<8x256xf32>
    %13 = tpu.matmul %11, %12, %cst {dimension_numbers = #tpu.dot_dimension_numbers<[1], [0], [0], [1], [0, 0, 1, 1], [], []>} : vector<8x128xbf16>, vector<128x256xbf16>, vector<8x256xf32> -> vector<8x256xf32>
    %14 = vector.broadcast %0 : vector<1x256xf32> to vector<8x256xf32>
    %15 = arith.addf %13, %14 : vector<8x256xf32>
    %cst_8 = arith.constant 0.000000e+00 : f32
    %16 = vector.broadcast %cst_8 : f32 to vector<8x256xf32>
    %17 = arith.subf %16, %15 : vector<8x256xf32>
    %18 = math.exp %17 : vector<8x256xf32>
    %cst_9 = arith.constant 1.000000e+00 : f32
    %19 = vector.broadcast %cst_9 : f32 to vector<8x256xf32>
    %20 = arith.addf %19, %18 : vector<8x256xf32>
    %cst_10 = arith.constant 1.000000e+00 : f32
    %21 = vector.broadcast %cst_10 : f32 to vector<8x256xf32>
    %22 = arith.divf %21, %20 : vector<8x256xf32>
    %23 = arith.mulf %15, %22 : vector<8x256xf32>
    %24 = arith.truncf %23 : vector<8x256xf32> to vector<8x256xbf16>
    %c0_11 = arith.constant 0 : index
    %c0_12 = arith.constant 0 : index
    %25 = vector.load %arg3[%c0_11, %c0_12] : memref<256x128xbf16, #tpu.memory_space<vmem>>, vector<256x128xbf16>
    %cst_13 = arith.constant dense<0.000000e+00> : vector<8x128xf32>
    %26 = tpu.matmul %24, %25, %cst_13 {dimension_numbers = #tpu.dot_dimension_numbers<[1], [0], [0], [1], [0, 0, 1, 1], [], []>} : vector<8x256xbf16>, vector<256x128xbf16>, vector<8x128xf32> -> vector<8x128xf32>
    %27 = vector.broadcast %1 : vector<1x128xf32> to vector<8x128xf32>
    %28 = arith.addf %26, %27 : vector<8x128xf32>
    %c0_14 = arith.constant 0 : index
    %c0_15 = arith.constant 0 : index
    %29 = vector.load %arg4[%c0_14, %c0_15] : memref<8x128xf32, #tpu.memory_space<vmem>>, vector<8x128xf32>
    tpu.vector_store %arg4[%c0_14, %c0_15], %28 {strides = array<i32>} : memref<8x128xf32, #tpu.memory_space<vmem>>, vector<8x128xf32>,
    return
  }
}

</mosaic_0001>

<bundles_post_ra>
// kernel: time_embedding_forward.1
= control target key start
LH: loop header
LB: loop body
LE: loop exit
PB: predicated region body
PF: predicated region fallthrough
CT: control target
= control target key end

     0   :  { %9 = vsyncpa [#allocation3], 0  ;;  %s813_s0 = inlined_call_operand.vmem [shape: f32[8,1], index: 0, kind: input, shape index: {}]   ;;  %s814_s1 = inlined_call_operand.vmem [shape: f32[1,640], index: 1, kind: input, shape index: {}]   ;;  %s815_s2 = inlined_call_operand.hbm [shape: bf16[128,256], index: 2, kind: input, shape index: {}]   ;;  %s816_s3 = inlined_call_operand.hbm [shape: bf16[256,128], index: 3, kind: input, shape index: {}]   ;;  %s817_s4 = inlined_call_operand.hbm [shape: f32[8,128], index: 4, kind: output, shape index: {}]  }
   0x1   :  { %10 = vsyncpa [#allocation6], 0 }
   0x2   :  { %11 = vsyncpa [#allocation4], 0  ;;  %s729_s15 = smov [#allocation2]  }
   0x3   :  { %s21_s16 = sshll.u32 %s729_s15, 4  ;;  %s22_s16 = int_to_ptr.vmem [resolvable:$true] %s21_s16 }
   0x4   :  { %s671_s17 = scalar_lea.vmem %s22_s16, 2048  ;;  %p676_p1 = scmp.lt.s32.totalorder %s22_s16, %s22_s16 }
   0x5   :  { %p672_p0 = scmp.ne.s32.totalorder %s22_s16, %s671_s17  ;;  %p677_p2 = scmp.lt.s32.totalorder %s671_s17, %s671_s17 }
   0x7   :  { %p678_p3 = por %p677_p2, %p676_p1 }
   0x9   :  { %p679_p4 = pnand %p678_p3, %p672_p0 }
   0xb   :  { %682 = shalt.err (!%p679_p4)
}
   0xc   :  { %s730_s18 = smov 128   ;;  %s731_s19 = smov 8  }
   0xd   :  { %27 = dma.hbm_to_vmem [thread:$0]  %s815_s2, 2048, %s22_s16, [#allocation3], %s730_s18, %s730_s18, %s731_s19  }
   0xe   :  { %s732_s22 = smov [#allocation5]  }
   0xf   :  { %s33_s23 = sshll.u32 %s732_s22, 4  ;;  %s34_s23 = int_to_ptr.vmem [resolvable:$true] %s33_s23 }
  0x10   :  { %s691_s24 = scalar_lea.vmem %s34_s23, 2048  ;;  %p696_p6 = scmp.lt.s32.totalorder %s34_s23, %s34_s23 }
  0x11   :  { %p692_p5 = scmp.ne.s32.totalorder %s34_s23, %s691_s24  ;;  %p697_p7 = scmp.lt.s32.totalorder %s691_s24, %s691_s24 }
  0x13   :  { %p698_p8 = por %p697_p7, %p696_p6 }
  0x15   :  { %p699_p9 = pnand %p698_p8, %p692_p5 }
  0x17   :  { %702 = shalt.err (!%p699_p9)
}
  0x18   :  { %s733_s25 = smov 64   ;;  %s734_s26 = smov 4  }
  0x19   :  { %39 = dma.hbm_to_vmem [thread:$0]  %s816_s3, 2048, %s34_s23, [#allocation6], %s733_s25, %s733_s25, %s734_s26  }
  0x1a   :  { %723 = dma.done.wait [#allocation3], 2048  }
  0x1b   :  { %724 = vsyncadd [#allocation3], 4294965248 }
  0x1c   :  { %725 = dma.done.wait [#allocation6], 2048  }
  0x1d   :  { %726 = vsyncadd [#allocation6], 4294965248  ;;  %v735_v0 = vmov 0   ;;  %v51_v1 = vld [vmem:[%s813_s0] sm:$0xff]  ;;  %v611_v2 = vld [vmem:[#allocation2 + $0x74] ss:$8 sps:$4 sm:$0xff]  }
  0x1e   :  { %610 = vset.pattern.permute.xlu0 %v735_v0  ;;  %315 = vmatprep.mubr.bf16.mxu0 %v735_v0  ;;  %v613_v3 = vld [vmem:[#allocation2 + $0x70] ss:$8 sps:$4 sm:$0xff]   ;;  %v614_v4 = vld [vmem:[#allocation2 + $0x64] ss:$8 sps:$4 sm:$0xff]   ;;  %v616_v5 = vld [vmem:[#allocation2 + $0x60] ss:$8 sps:$4 sm:$0xff]  }
  0x1f   :  { %54 = vperm.xlu0 %610, %v51_v1   ;;  %283 = vmatprep.subr.bf16.mxu0 %v611_v2  ;;  %v617_v6 = vld [vmem:[#allocation2 + $0x54] ss:$8 sps:$4 sm:$0xff]   ;;  %v619_v7 = vld [vmem:[#allocation2 + $0x50] ss:$8 sps:$4 sm:$0xff]   ;;  %v620_v8 = vld [vmem:[#allocation2 + $0x44] ss:$8 sps:$4 sm:$0xff]  }
  0x20   :  { %284 = vmatpush1.bf16.msra.mxu0 %v613_v3  ;;  %v622_v9 = vld [vmem:[#allocation2 + $0x40] ss:$8 sps:$4 sm:$0xff]   ;;  %v623_v10 = vld [vmem:[#allocation2 + $0x34] ss:$8 sps:$4 sm:$0xff]   ;;  %v625_v11 = vld [vmem:[#allocation2 + $0x30] ss:$8 sps:$4 sm:$0xff]  }
  0x21   :  { %285 = vmatprep.subr.bf16.mxu0 %v614_v4  ;;  %v626_v12 = vld [vmem:[#allocation2 + $0x24] ss:$8 sps:$4 sm:$0xff]   ;;  %v628_v13 = vld [vmem:[#allocation2 + $0x20] ss:$8 sps:$4 sm:$0xff]   ;;  %v629_v14 = vld [vmem:[#allocation2 + $0x14] ss:$8 sps:$4 sm:$0xff]  }
  0x22   :  { %v631_v15 = vld [vmem:[#allocation2 + $0x10] ss:$8 sps:$4 sm:$0xff]   ;;  %v632_v16 = vld [vmem:[#allocation2 + $0x4] ss:$8 sps:$4 sm:$0xff]   ;;  %v634_v17 = vld [vmem:[#allocation2] ss:$8 sps:$4 sm:$0xff]  }
  0x23   :  { %v531_v18 = vld [vmem:[%s814_s1 + $0x3] ss:$0 sm:$0xff]  ;;  %v532_v20 = vld [vmem:[%s814_s1 + $0x4] ss:$0 sm:$0xff]  ;;  %v736_v33 = vmov 683565275  }
  0x24   :  { %286 = vmatpush1.bf16.msra.mxu0 %v616_v5  ;;  %v737_v35 = vmov 2475754826   ;;  %v738_v38 = vmov 2131351028   ;;  %v739_v41 = vmov 2102212464  }
  0x25   :  { %287 = vmatprep.subr.bf16.mxu0 %v617_v6  ;;  %v740_v44 = vmov 920167782   ;;  %v741_v47 = vmov 1326507024   ;;  %s742_s10 = smov [#allocation7]  }
  0x26   :  { %s521_s11 = sshll.u32 %s742_s10, 4  ;;  %s522_s11 = int_to_ptr.vmem [resolvable:$true] %s521_s11 }
  0x27   :  { %s703_s12 = scalar_lea.vmem %s522_s11, 128  ;;  %p708_p11 = scmp.lt.s32.totalorder %s522_s11, %s522_s11 }
  0x28   :  { %288 = vmatpush1.bf16.msra.mxu0 %v619_v7  ;;  %p704_p10 = scmp.ne.s32.totalorder %s522_s11, %s703_s12  ;;  %p709_p12 = scmp.lt.s32.totalorder %s703_s12, %s703_s12 }
  0x29   :  { %289 = vmatprep.subr.bf16.mxu0 %v620_v8 }
  0x2a   :  { %p710_p13 = por %p709_p12, %p708_p11 }
  0x2c   :  { %290 = vmatpush1.bf16.msra.mxu0 %v622_v9  ;;  %p711_p0 = pnand %p710_p13, %p704_p10 }
  0x2d   :  { %291 = vmatprep.subr.bf16.mxu0 %v623_v10 }
  0x30   :  { %292 = vmatpush1.bf16.msra.mxu0 %v625_v11 }
  0x31   :  { %293 = vmatprep.subr.bf16.mxu0 %v626_v12 }
  0x34   :  { %294 = vmatpush1.bf16.msra.mxu0 %v628_v13 }
  0x35   :  { %295 = vmatprep.subr.bf16.mxu0 %v629_v14 }
  0x38   :  { %296 = vmatpush1.bf16.msra.mxu0 %v631_v15 }
  0x39   :  { %297 = vmatprep.subr.bf16.mxu0 %v632_v16 }
  0x3c   :  { %298 = vmatpush1.bf16.msra.mxu0 %v634_v17 }
  0x9a   :  { %v55_v19 = vpop.permute.xlu0 %54 }
  0x9b   :  { %v63_v21 = vmul.f32 %v531_v18, %v55_v19 }
  0x9d   :  { %v783_v22 = vadd.f32 %v532_v20, %v63_v21 }
  0x9f   :  { %v74_v23 = vand.u32 2139095040, %v783_v22  ;;  %v71_v27 = vand.u32 2147483647, %v783_v22  ;;  %vm73_vm7 = vcmp.lt.s32.totalorder %v783_v22, 0  ;;  %vm163_vm12 = vweird.f32 %v783_v22 }
  0xa1   :  { %v75_v24 = vshrl.u32 %v74_v23, 23  ;;  %v78_v30 = vand.u32 8388607, %v71_v27  ;;  %vm72_vm8 = vcmp.le.f32.partialorder %v71_v27, 0.7853982 }
  0xa3   :  { %v533_v25 = vadd.s32 4294967169, %v75_v24  ;;  %v79_v49 = vor.u32 8388608, %v78_v30 }
  0xa5   :  { %v81_v26 = vadd.s32 1, %v533_v25  ;;  %v119_v63 = vshll.u32 %v79_v49, 8 }
  0xa7   :  { %vm82_vm0 = vcmp.gt.s32.totalorder %v81_v26, 0 }
  0xa8   :  { %v83_v28 = vsel %vm82_vm0, %v81_v26, 0 }
  0xa9   :  { %v85_v29 = vand.u32 31, %v83_v28  ;;  %v84_v32 = vshrl.u32 %v83_v28, 5 }
  0xab   :  { %v86_v31 = vsub.s32 32, %v85_v29  ;;  %v88_v34 = vshll.u32 %v736_v33, %v85_v29  ;;  %v91_v36 = vshll.u32 %v737_v35, %v85_v29  ;;  %v94_v40 = vshll.u32 %v738_v38, %v85_v29 }
  0xac   :  { %v97_v43 = vshll.u32 %v739_v41, %v85_v29  ;;  %v100_v46 = vshll.u32 %v740_v44, %v85_v29  ;;  %vm103_vm1 = vcmp.lt.s32.totalorder %v84_v32, 1  ;;  %vm106_vm2 = vcmp.lt.s32.totalorder %v84_v32, 4 }
  0xad   :  { %v89_v37 = vshrl.u32 %v737_v35, %v86_v31  ;;  %v92_v39 = vshrl.u32 %v738_v38, %v86_v31  ;;  %v95_v42 = vshrl.u32 %v739_v41, %v86_v31  ;;  %v98_v45 = vshrl.u32 %v740_v44, %v86_v31 }
  0xae   :  { %v101_v48 = vshrl.u32 %v741_v47, %v86_v31  ;;  %v87_v58 = vshrl.u32 %v736_v33, %v86_v31  ;;  %vm105_vm3 = vcmp.lt.s32.totalorder %v84_v32, 3  ;;  %vm104_vm4 = vcmp.lt.s32.totalorder %v84_v32, 2 }
  0xaf   :  { %v90_v50 = vor.u32 %v89_v37, %v88_v34  ;;  %v93_v51 = vor.u32 %v92_v39, %v91_v36  ;;  %v96_v52 = vor.u32 %v95_v42, %v94_v40  ;;  %v99_v53 = vor.u32 %v98_v45, %v97_v43 }
  0xb0   :  { %v102_v54 = vor.u32 %v101_v48, %v100_v46 }
  0xb1   :  { %v108_v55 = vsel %vm106_vm2, %v96_v52, 2102212464  ;;  %v111_v56 = vsel %vm103_vm1, %v90_v50, %v93_v51  ;;  %v115_v57 = vsel %vm103_vm1, %v93_v51, %v96_v52  ;;  %v112_v59 = vsel %vm106_vm2, %v99_v53, 920167782 }
  0xb2   :  { %v116_v60 = vsel %vm106_vm2, %v102_v54, 1326507024  ;;  %v113_v61 = vsel %vm105_vm3, %v96_v52, %v112_v59  ;;  %v107_v0 = vsel %vm103_vm1, %v87_v58, %v90_v50  ;;  %v109_v1 = vsel %vm105_vm3, %v93_v51, %v108_v55  ;;  %v635_v52 = vld [vmem:[#allocation5 + $0x78] sm:$0xff]   ;;  %v637_v54 = vld [vmem:[#allocation5 + $0x70] sm:$0xff]   ;;  %v641_v58 = vld [vmem:[#allocation5 + $0x60] sm:$0xff]  }
  0xb3   :  { %v117_v62 = vsel %vm105_vm3, %v99_v53, %v116_v60  ;;  %v114_v2 = vsel %vm104_vm4, %v111_v56, %v113_v61  ;;  %v110_v8 = vsel %vm104_vm4, %v107_v0, %v109_v1  ;;  %v636_v53 = vld [vmem:[#allocation5 + $0x38] sm:$0xff]   ;;  %570 = vmatprep.subr.bf16.mxu1 %v635_v52  ;;  %v638_v55 = vld [vmem:[#allocation5 + $0x30] sm:$0xff]   ;;  %v639_v56 = vld [vmem:[#allocation5 + $0x68] sm:$0xff]  }
  0xb4   :  { %v118_v3 = vsel %vm104_vm4, %v115_v57, %v117_v62  ;;  %v792_v6 = vmul.u32.u64.low %v119_v63, %v114_v2  ;;  %v793_v7 = vmul.u32.u64.high %v119_v63, %v114_v2, %v792_v6  ;;  %v126_v10 = vmul.u32 %v119_v63, %v110_v8  ;;  %571 = vmatpush3.bf16.msra.mxu1 %v636_v53  ;;  %v640_v57 = vld [vmem:[#allocation5 + $0x28] sm:$0xff]   ;;  %v642_v59 = vld [vmem:[#allocation5 + $0x20] sm:$0xff]   ;;  %v644_v60 = vld [vmem:[#allocation5 + $0x18] sm:$0xff]  }
  0xb5   :  { %v789_v4 = vmul.u32.u64.low %v119_v63, %v118_v3  ;;  %v790_v5 = vmul.u32.u64.high %v119_v63, %v118_v3, %v789_v4  ;;  %572 = vmatprep.subr.bf16.mxu1 %v637_v54  ;;  %v645_v61 = vld [vmem:[#allocation5 + $0x50] sm:$0xff]   ;;  %v647_v63 = vld [vmem:[#allocation5 + $0x48] sm:$0xff]   ;;  %v649_v1 = vld [vmem:[#allocation5 + $0x40] sm:$0xff]   ;;  %v193_v3 = vlaneseq }
  0xb6   :  { %v129_v9 = vadd.s32 1, %v793_v7  ;;  %v646_v62 = vld [vmem:[#allocation5 + $0x10] sm:$0xff]   ;;  %v648_v0 = vld [vmem:[#allocation5 + $0x8] sm:$0xff]   ;;  %v650_v2 = vld [vmem:[#allocation5] sm:$0xff]  }
  0xb7   :  { %vm128_vm5 = vc.u32 %v790_v5, %v792_v6  ;;  %v127_v23 = vadd.s32 %v792_v6, %v790_v5  ;;  %v194_v4 = vshrl.u32 %v193_v3, 7  ;;  %v47_v6 = vld [vmem:[%s814_s1] sm:$0x3] }
  0xb8   :  { %v130_v11 = vsel %vm128_vm5, %v129_v9, %v793_v7  ;;  %573 = vmatpush3.bf16.msra.mxu1 %v638_v55 }
  0xb9   :  { %v131_v12 = vadd.s32 %v130_v11, %v126_v10  ;;  %574 = vmatprep.subr.bf16.mxu1 %v639_v56  ;;  %v195_v5 = vsub.s32 0, %v194_v4  ;;  %v199_v7 = vsub.s32 1, %v194_v4 }
  0xbb   :  { %v132_v13 = vadd.s32 536870912, %v131_v12  ;;  %v196_v8 = vrot.slane %v47_v6, %v195_v5  ;;  %v200_v9 = vrot.slane %v47_v6, %v199_v7 }
  0xbc   :  { %575 = vmatpush3.bf16.msra.mxu1 %v640_v57 }
  0xbd   :  { %v133_v14 = vshrl.u32 %v132_v13, 30  ;;  %576 = vmatprep.subr.bf16.mxu1 %v641_v58 }
  0xbf   :  { %v134_v15 = vshll.u32 %v133_v14, 30  ;;  %v157_v37 = vsub.s32 4, %v133_v14 }
  0xc0   :  { %577 = vmatpush3.bf16.msra.mxu1 %v642_v59 }
  0xc1   :  { %v135_v16 = vsub.s32 %v131_v12, %v134_v15  ;;  %v158_v40 = vsel %vm73_vm7, %v157_v37, %v133_v14 }
  0xc2   :  { %v160_v41 = vsel %vm72_vm8, 0, %v158_v40 }
  0xc3   :  { %v137_v17 = vsub.s32 0, %v135_v16  ;;  %v164_v42 = vadd.s32 3, %v160_v41 }
  0xc5   :  { %v534_v18 = vmin.u32 %v137_v17, %v135_v16  ;;  %v165_v43 = vand.u32 3, %v164_v42 }
  0xc7   :  { %v139_v19 = vclz %v534_v18  ;;  %vm170_vm9 = vcmp.eq.s32.totalorder %v165_v43, 2  ;;  %vm167_vm10 = vcmp.eq.s32.totalorder %v165_v43, 0  ;;  %vm166_vm11 = vcmp.lt.s32.totalorder %v165_v43, 2 }
  0xc9   :  { %v535_v20 = vadd.s32 4294967294, %v139_v19 }
  0xcb   :  { %vm536_vm6 = vcmp.lt.s32.totalorder %v535_v20, 0 }
  0xcc   :  { %v142_v21 = vsel %vm536_vm6, 0, %v535_v20 }
  0xcd   :  { %v143_v24 = vsub.s32 32, %v142_v21  ;;  %v147_v25 = vsub.s32 4294967266, %v142_v21  ;;  %v144_v26 = vshll.u32 %v135_v16, %v142_v21 }
  0xcf   :  { %v145_v28 = vshrl.u32 %v127_v23, %v143_v24  ;;  %v148_v29 = vadd.s32 127, %v147_v25 }
  0xd1   :  { %v146_v30 = vor.u32 %v145_v28, %v144_v26  ;;  %v149_v31 = vshll.u32 %v148_v29, 23 }
  0xd3   :  { %v150_v32 = vor.u32 4788187, %v149_v31  ;;  %v153_v34 = vcvt.s32.f32 %v146_v30 }
  0xd5   :  { %v151_v33 = vand.u32 2147483647, %v150_v32 }
  0xd7   :  { %v154_v35 = vmul.f32 %v153_v34, %v151_v33  ;;  %v553_v33 = vld [vmem:[%s814_s1 + $0x2] ss:$0 sm:$0xff] }
  0xd9   :  { %v155_v36 = vxor.u32 2147483648, %v154_v35 }
  0xdb   :  { %v156_v38 = vsel %vm73_vm7, %v155_v36, %v154_v35 }
  0xdc   :  { %v159_v39 = vsel %vm72_vm8, %v783_v22, %v156_v38  ;;  %v643_v22 = vld [vmem:[#allocation5 + $0x58] sm:$0xff]  }
  0xdd   :  { %651 = vcosq.f32 %v159_v39  ;;  %578 = vmatprep.subr.bf16.mxu1 %v643_v22 }
  0xde   :  { %653 = vsinq.f32 %v159_v39  ;;  %579 = vmatpush3.bf16.msra.mxu1 %v644_v60 }
  0xdf   :  { %580 = vmatprep.subr.bf16.mxu1 %v645_v61 }
  0xe2   :  { %581 = vmatpush3.bf16.msra.mxu1 %v646_v62 }
  0xe3   :  { %582 = vmatprep.subr.bf16.mxu1 %v647_v63 }
  0xe6   :  { %583 = vmatpush3.bf16.msra.mxu1 %v648_v0 }
  0xe7   :  { %584 = vmatprep.subr.bf16.mxu1 %v649_v1 }
  0xea   :  { %v652_v44 = vpop.eup %651  ;;  %585 = vmatpush3.bf16.msra.mxu1 %v650_v2 }
  0xeb   :  { %v654_v45 = vpop.eup %653  ;;  %v171_v46 = vxor.u32 2147483648, %v652_v44 }
  0xec   :  { %v168_v47 = vxor.u32 2147483648, %v654_v45 }
  0xed   :  { %v172_v48 = vsel %vm170_vm9, %v171_v46, %v654_v45 }
  0xee   :  { %v169_v49 = vsel %vm167_vm10, %v652_v44, %v168_v47 }
  0xef   :  { %v173_v27 = vsel %vm166_vm11, %v169_v49, %v172_v48 }
  0xf0   :  { %v174_v50 = vsel %vm163_vm12, nan, %v173_v27 }
  0xf1   :  { %v175_v51 = vpack.c.bf16 %v174_v50, %v174_v50 }
  0xf3   :  { %316 = vmatmul.mubr.bf16.vlgmr.msra.gmra.mxu0 %v175_v51 }
 0x1b3   :  { %v317_v10 = vpop.f32.mrf.mxu0 }
 0x1b4   :  { %v318_v11 = vadd.f32 %v317_v10, %v196_v8 }
 0x1b5   :  { %v319_v12 = vpop.f32.mrf.mxu0 }
 0x1b6   :  { %v324_v13 = vsub.f32 0.0, %v318_v11  ;;  %v320_v14 = vadd.f32 %v319_v12, %v200_v9 }
 0x1b7   :  { %v321_v15 = vpop.f32.mrf.mxu0 }
 0x1b8   :  { %v326_v16 = vmul.f32 1.442695, %v324_v13  ;;  %v325_v17 = vsub.f32 0.0, %v320_v14 }
 0x1b9   :  { %v322_v18 = vpop.f32.mrf.mxu0 }
 0x1ba   :  { %655 = vpow2.f32 %v326_v16  ;;  %v328_v19 = vmul.f32 1.442695, %v325_v17 }
 0x1bc   :  { %657 = vpow2.f32 %v328_v19 }
 0x1c7   :  { %v656_v20 = vpop.eup %655 }
 0x1c8   :  { %v330_v21 = vadd.f32 1.0, %v656_v20 }
 0x1c9   :  { %v658_v23 = vpop.eup %657 }
 0x1ca   :  { %659 = vrcp.f32 %v330_v21  ;;  %v331_v24 = vadd.f32 1.0, %v658_v23 }
 0x1cc   :  { %661 = vrcp.f32 %v331_v24 }
 0x1d7   :  { %v660_v25 = vpop.eup %659 }
 0x1d8   :  { %v336_v28 = vmul.f32 %v660_v25, %v318_v11 }
 0x1d9   :  { %v662_v26 = vpop.eup %661 }
 0x1da   :  { %v337_v29 = vmul.f32 %v662_v26, %v320_v14  ;;  %v338_v31 = vpack.c.bf16 %v336_v28, %v336_v28 }
 0x1dc   :  { %v339_v30 = vpack.c.bf16 %v337_v29, %v337_v29 }
 0x1de   :  { %506 = vmatprep.mubr.bf16.mxu1 %v339_v30 }
 0x1df   :  { %507 = vmatmul.mubr.bf16.vlgmr.msra.gmra.mxu1 %v338_v31 }
 0x29f   :  { %v586_v32 = vpop.f32.mrf.mxu1 }
 0x2a1   :  { %v587_v34 = vpop.f32.mrf.mxu1 }
 0x2a2   :  { %v588_v35 = vadd.f32 %v587_v34, %v586_v32 }
 0x2a3   :  { %v589_v36 = vpop.f32.mrf.mxu1 }
 0x2a4   :  { %v509_v37 = vadd.f32 %v588_v35, %v553_v33 }
 0x2a5   :  { %v590_v38 = vpop.f32.mrf.mxu1 }
 0x2a6   :  { %514 = vst [vmem:[#allocation7] sm:$0xff] %v509_v37 }
 0x2a7   :  { %714 = shalt.err (!%p711_p0)
}
 0x2a8   :  { %524 = dma.vmem_to_hbm [thread:$0]  %s522_s11, 128, %s817_s4, [#allocation4]  }
 0x2a9   :  { %727 = dma.done.wait [#allocation4], 128  }
 0x2aa   :  { %728 = vsyncadd [#allocation4], 4294967168 }
 0x2ab   :  { %528 = vsyncpa [#allocation3], 1 }
 0x2ac   :  { %529 = vsyncpa [#allocation6], 1 }
 0x2ad   :  { %530 = vsyncpa [#allocation4], 1 }

</bundles_post_ra>
